<compile_context>
chip_gen: v5e
topology: v5e:2x2
jax: 0.10.0
libtpu: 0.0.40
codegen_flags: <defaults>
</compile_context>

<pallas_src>
import jax
import jax.numpy as jnp
import numpy as np
from jax.experimental import pallas as pl
from jax.experimental.pallas import tpu as pltpu

# Module hyperparameters (from the PyTorch source).
BATCH_SIZE = 1
HIDDEN_SIZE = 4
INPUT_SIZE = 4
NUM_LAYERS = 2  # kernel below is written for exactly 2 layers
SEQ_LEN = 8

# Packed-parameter slab layout: one (8,128) f32 tile == one vreg, one DMA.
#   rows 0..H-1 : [ wih0 (H,I) | whh0 (H,H) | wih1 (H,H) | whh1 (H,H) | pad ]
#   row  H      : [ b0 (1,H)   | b1 (1,H)   | pad ]            (b = b_ih + b_hh)
_P_ROWS = 8
_P_COLS = 128
_C_WIH0 = 0
_C_WHH0 = _C_WIH0 + INPUT_SIZE
_C_WIH1 = _C_WHH0 + HIDDEN_SIZE
_C_WHH1 = _C_WIH1 + HIDDEN_SIZE


def _rnn2_kernel(x_ref, p_ref, out_ref):
    """2-layer tanh RNN over the full (statically unrolled) sequence.

    x_ref:   (T*B, I)       input rows in (t, b) order
    p_ref:   (8, 128)       packed parameter slab (see layout above)
    out_ref: (T*B, H)       top-layer hidden state at every timestep
    """
    B = BATCH_SIZE
    H = HIDDEN_SIZE
    I = INPUT_SIZE
    TB = x_ref.shape[0]
    T = TB // B

    # --- hoisted loads & static slices (one-time, off the recurrent chain) ---
    x = x_ref[...]                              # (T*B, I)
    p = p_ref[...]                              # (8, 128)
    wih0 = p[0:H, _C_WIH0:_C_WIH0 + I]          # (H, I)
    whh0 = p[0:H, _C_WHH0:_C_WHH0 + H]          # (H, H)
    wih1 = p[0:H, _C_WIH1:_C_WIH1 + H]          # (H, H)
    whh1 = p[0:H, _C_WHH1:_C_WHH1 + H]          # (H, H)
    b0 = p[H:H + 1, 0:H]                        # (1, H)
    b1 = p[H:H + 1, H:2 * H]                    # (1, H)

    # Layer-0 input projection for every timestep at once (off the recurrent
    # critical path): a0[row] = x[row] @ Wih0^T + b0  ->  (T*B, H)
    a0 = jnp.sum(x[:, None, :] * wih0[None, :, :], axis=-1) + b0

    # Pre-broadcast recurrent weights once (JAX does not CSE broadcast_in_dim).
    whh0_b = whh0[None, :, :]                   # (1, H, H)
    wih1_b = wih1[None, :, :]                   # (1, H, H)
    whh1_b = whh1[None, :, :]                   # (1, H, H)
    b1_b = jnp.broadcast_to(b1, (B, H))         # hoisted bias broadcast

    def matvec_t(v, w_b):
        # v: (B, K), w_b: (1, H, K)  ->  v @ W^T : (B, H)
        # Tiny dims (<=4): VPU broadcast-multiply + lane reduction, no MXU.
        return jnp.sum(v[:, None, :] * w_b, axis=-1)

    h0 = jnp.zeros((B, H), jnp.float32)
    h1 = jnp.zeros((B, H), jnp.float32)
    for t in range(T):                          # static full unroll (T = 8)
        # layer 0: h0_t = tanh(x_t @ Wih0^T + b0 + h0_{t-1} @ Whh0^T)
        h0 = jnp.tanh(a0[t * B:(t + 1) * B, :] + matvec_t(h0, whh0_b))
        # layer 1: h1_t = tanh(h0_t @ Wih1^T + h1_{t-1} @ Whh1^T + b1)
        h1 = jnp.tanh(matvec_t(h0, wih1_b) + matvec_t(h1, whh1_b) + b1_b)
        # Per-step static row store into the VMEM-resident output tile
        # (replaces the old sublane concatenate; HBM writeback is still one
        # block DMA, and this store is off the recurrent critical path).
        out_ref[t * B:(t + 1) * B, :] = h1


def pack_params(params):
    """Pack the 6 weight/bias arrays into one (8,128) f32 slab (single DMA)."""
    wih0, whh0, b0, wih1, whh1, b1 = params
    H, I = HIDDEN_SIZE, INPUT_SIZE
    p = jnp.zeros((_P_ROWS, _P_COLS), jnp.float32)
    p = p.at[0:H, _C_WIH0:_C_WIH0 + I].set(wih0)
    p = p.at[0:H, _C_WHH0:_C_WHH0 + H].set(whh0)
    p = p.at[0:H, _C_WIH1:_C_WIH1 + H].set(wih1)
    p = p.at[0:H, _C_WHH1:_C_WHH1 + H].set(whh1)
    p = p.at[H:H + 1, 0:H].set(b0)
    p = p.at[H:H + 1, H:2 * H].set(b1)
    return p


def rnn_forward(x, packed_params):
    """x: (T, B, I) float32 (seq-major). Returns (T*B, H) float32."""
    T, B, I = x.shape
    H = HIDDEN_SIZE
    x_rows = x.reshape(T * B, I)                # (t, b) row order == out.view(-1, H)
    out = pl.pallas_call(
        _rnn2_kernel,
        out_shape=jax.ShapeDtypeStruct((T * B, H), jnp.float32),
        grid=(1,),
        in_specs=[
            pl.BlockSpec((T * B, I), lambda i: (0, 0)),
            pl.BlockSpec((_P_ROWS, _P_COLS), lambda i: (0, 0)),
        ],
        out_specs=pl.BlockSpec((T * B, H), lambda i: (0, 0)),
        compiler_params=pltpu.CompilerParams(
            dimension_semantics=("arbitrary",)),
    )(x_rows, packed_params)
    return out                                  # already the out.view(-1, hidden) shape


def init_params(key):
    """Deterministic init mimicking torch.nn.RNN (uniform +-1/sqrt(H))."""
    H, I = HIDDEN_SIZE, INPUT_SIZE
    bound = 1.0 / np.sqrt(H)
    ks = jax.random.split(key, 8)
    u = lambda k, shape: jax.random.uniform(k, shape, jnp.float32, -bound, bound)
    wih0 = u(ks[0], (H, I))
    whh0 = u(ks[1], (H, H))
    b_ih0 = u(ks[2], (H,))
    b_hh0 = u(ks[3], (H,))
    wih1 = u(ks[4], (H, H))
    whh1 = u(ks[5], (H, H))
    b_ih1 = u(ks[6], (H,))
    b_hh1 = u(ks[7], (H,))
    b0 = (b_ih0 + b_hh0).reshape(1, H)
    b1 = (b_ih1 + b_hh1).reshape(1, H)
    return (wih0, whh0, b0, wih1, whh1, b1)


def rnn_reference(x, params):
    """Pure-JAX reference of the same 2-layer tanh RNN."""
    wih0, whh0, b0, wih1, whh1, b1 = params
    T, B, _ = x.shape
    h0 = jnp.zeros((B, HIDDEN_SIZE), jnp.float32)
    h1 = jnp.zeros((B, HIDDEN_SIZE), jnp.float32)
    outs = []
    for t in range(T):
        h0 = jnp.tanh(x[t] @ wih0.T + h0 @ whh0.T + b0)
        h1 = jnp.tanh(h0 @ wih1.T + h1 @ whh1.T + b1)
        outs.append(h1)
    return jnp.stack(outs, axis=0).reshape(T * B, HIDDEN_SIZE)


if __name__ == "__main__":
    key = jax.random.PRNGKey(0)
    k_x, k_p = jax.random.split(key)
    x = jax.random.normal(k_x, (SEQ_LEN, BATCH_SIZE, INPUT_SIZE), jnp.float32)
    params = init_params(k_p)
    packed = pack_params(params)

    out = rnn_forward(x, packed)
    out = jax.block_until_ready(out)

    ref = rnn_reference(x, params)
    np.testing.assert_allclose(np.asarray(out), np.asarray(ref),
                               rtol=1e-4, atol=1e-5)
    assert out.shape == (SEQ_LEN * BATCH_SIZE, HIDDEN_SIZE)
    print("KERNEL_OK")
</pallas_src>

<mosaic_0001>
module attributes {stable_mosaic.version = 11 : i64} {
  func.func @_rnn2_kernel(%arg0: i32, %arg1: memref<8x4xf32, #tpu.memory_space<vmem>>, %arg2: memref<8x128xf32, #tpu.memory_space<vmem>>, %arg3: memref<8x4xf32, #tpu.memory_space<vmem>>) attributes {dimension_semantics = [#tpu.dimension_semantics<arbitrary>], iteration_bounds = array<i64: 1>, scalar_prefetch = 0 : i64, scratch_operands = 0 : i64, tpu.core_type = #tpu.core_type<tc>, window_params = [{pipeline_mode = #tpu.pipeline_mode<synchronous>, transform_indices = @transform_0, window_bounds = array<i64: 8, 4>}, {pipeline_mode = #tpu.pipeline_mode<synchronous>, transform_indices = @transform_1, window_bounds = array<i64: 8, 128>}, {pipeline_mode = #tpu.pipeline_mode<synchronous>, transform_indices = @transform_2, window_bounds = array<i64: 8, 4>}]} {
    %c0 = arith.constant 0 : index
    %c0_0 = arith.constant 0 : index
    %0 = vector.load %arg1[%c0, %c0_0] : memref<8x4xf32, #tpu.memory_space<vmem>>, vector<8x4xf32>
    %c0_1 = arith.constant 0 : index
    %c0_2 = arith.constant 0 : index
    %1 = vector.load %arg2[%c0_1, %c0_2] : memref<8x128xf32, #tpu.memory_space<vmem>>, vector<8x128xf32>
    %2 = vector.extract_strided_slice %1 {offsets = [0, 0], sizes = [4, 4], strides = [1, 1]} : vector<8x128xf32> to vector<4x4xf32>
    %3 = vector.extract_strided_slice %1 {offsets = [0, 4], sizes = [4, 4], strides = [1, 1]} : vector<8x128xf32> to vector<4x4xf32>
    %4 = vector.extract_strided_slice %1 {offsets = [0, 8], sizes = [4, 4], strides = [1, 1]} : vector<8x128xf32> to vector<4x4xf32>
    %5 = vector.extract_strided_slice %1 {offsets = [0, 12], sizes = [4, 4], strides = [1, 1]} : vector<8x128xf32> to vector<4x4xf32>
    %6 = vector.extract_strided_slice %1 {offsets = [4, 0], sizes = [1, 4], strides = [1, 1]} : vector<8x128xf32> to vector<1x4xf32>
    %7 = vector.extract_strided_slice %1 {offsets = [4, 4], sizes = [1, 4], strides = [1, 1]} : vector<8x128xf32> to vector<1x4xf32>
    %8 = vector.shape_cast %0 : vector<8x4xf32> to vector<8x1x4xf32>
    %9 = vector.shape_cast %2 : vector<4x4xf32> to vector<1x4x4xf32>
    %10 = vector.broadcast %8 : vector<8x1x4xf32> to vector<8x4x4xf32>
    %11 = vector.broadcast %9 : vector<1x4x4xf32> to vector<8x4x4xf32>
    %12 = arith.mulf %10, %11 : vector<8x4x4xf32>
    %cst = arith.constant dense<0.000000e+00> : vector<8x4xf32>
    %13 = vector.multi_reduction <add>, %12, %cst [2] : vector<8x4x4xf32> to vector<8x4xf32>
    %14 = vector.broadcast %6 : vector<1x4xf32> to vector<8x4xf32>
    %15 = arith.addf %13, %14 : vector<8x4xf32>
    %16 = vector.shape_cast %3 : vector<4x4xf32> to vector<1x4x4xf32>
    %17 = vector.shape_cast %4 : vector<4x4xf32> to vector<1x4x4xf32>
    %18 = vector.shape_cast %5 : vector<4x4xf32> to vector<1x4x4xf32>
    %cst_3 = arith.constant 0.000000e+00 : f32
    %19 = vector.broadcast %cst_3 : f32 to vector<1x4xf32>
    %cst_4 = arith.constant 0.000000e+00 : f32
    %20 = vector.broadcast %cst_4 : f32 to vector<1x4xf32>
    %21 = vector.extract_strided_slice %15 {offsets = [0, 0], sizes = [1, 4], strides = [1, 1]} : vector<8x4xf32> to vector<1x4xf32>
    %22 = vector.shape_cast %19 : vector<1x4xf32> to vector<1x1x4xf32>
    %23 = vector.broadcast %22 : vector<1x1x4xf32> to vector<1x4x4xf32>
    %24 = arith.mulf %23, %16 : vector<1x4x4xf32>
    %cst_5 = arith.constant dense<0.000000e+00> : vector<1x4xf32>
    %25 = vector.multi_reduction <add>, %24, %cst_5 [2] : vector<1x4x4xf32> to vector<1x4xf32>
    %26 = arith.addf %21, %25 : vector<1x4xf32>
    %27 = math.tanh %26 : vector<1x4xf32>
    %28 = vector.shape_cast %27 : vector<1x4xf32> to vector<1x1x4xf32>
    %29 = vector.broadcast %28 : vector<1x1x4xf32> to vector<1x4x4xf32>
    %30 = arith.mulf %29, %17 : vector<1x4x4xf32>
    %cst_6 = arith.constant dense<0.000000e+00> : vector<1x4xf32>
    %31 = vector.multi_reduction <add>, %30, %cst_6 [2] : vector<1x4x4xf32> to vector<1x4xf32>
    %32 = vector.shape_cast %20 : vector<1x4xf32> to vector<1x1x4xf32>
    %33 = vector.broadcast %32 : vector<1x1x4xf32> to vector<1x4x4xf32>
    %34 = arith.mulf %33, %18 : vector<1x4x4xf32>
    %cst_7 = arith.constant dense<0.000000e+00> : vector<1x4xf32>
    %35 = vector.multi_reduction <add>, %34, %cst_7 [2] : vector<1x4x4xf32> to vector<1x4xf32>
    %36 = arith.addf %31, %35 : vector<1x4xf32>
    %37 = arith.addf %36, %7 : vector<1x4xf32>
    %38 = math.tanh %37 : vector<1x4xf32>
    %c0_8 = arith.constant 0 : index
    %c0_9 = arith.constant 0 : index
    %39 = vector.load %arg3[%c0_8, %c0_9] : memref<8x4xf32, #tpu.memory_space<vmem>>, vector<1x4xf32>
    tpu.vector_store %arg3[%c0_8, %c0_9], %38 {strides = array<i32>} : memref<8x4xf32, #tpu.memory_space<vmem>>, vector<1x4xf32>,
    %40 = vector.extract_strided_slice %15 {offsets = [1, 0], sizes = [1, 4], strides = [1, 1]} : vector<8x4xf32> to vector<1x4xf32>
    %41 = vector.shape_cast %27 : vector<1x4xf32> to vector<1x1x4xf32>
    %42 = vector.broadcast %41 : vector<1x1x4xf32> to vector<1x4x4xf32>
    %43 = arith.mulf %42, %16 : vector<1x4x4xf32>
    %cst_10 = arith.constant dense<0.000000e+00> : vector<1x4xf32>
    %44 = vector.multi_reduction <add>, %43, %cst_10 [2] : vector<1x4x4xf32> to vector<1x4xf32>
    %45 = arith.addf %40, %44 : vector<1x4xf32>
    %46 = math.tanh %45 : vector<1x4xf32>
    %47 = vector.shape_cast %46 : vector<1x4xf32> to vector<1x1x4xf32>
    %48 = vector.broadcast %47 : vector<1x1x4xf32> to vector<1x4x4xf32>
    %49 = arith.mulf %48, %17 : vector<1x4x4xf32>
    %cst_11 = arith.constant dense<0.000000e+00> : vector<1x4xf32>
    %50 = vector.multi_reduction <add>, %49, %cst_11 [2] : vector<1x4x4xf32> to vector<1x4xf32>
    %51 = vector.shape_cast %38 : vector<1x4xf32> to vector<1x1x4xf32>
    %52 = vector.broadcast %51 : vector<1x1x4xf32> to vector<1x4x4xf32>
    %53 = arith.mulf %52, %18 : vector<1x4x4xf32>
    %cst_12 = arith.constant dense<0.000000e+00> : vector<1x4xf32>
    %54 = vector.multi_reduction <add>, %53, %cst_12 [2] : vector<1x4x4xf32> to vector<1x4xf32>
    %55 = arith.addf %50, %54 : vector<1x4xf32>
    %56 = arith.addf %55, %7 : vector<1x4xf32>
    %57 = math.tanh %56 : vector<1x4xf32>
    %c1 = arith.constant 1 : index
    %c0_13 = arith.constant 0 : index
    %58 = vector.load %arg3[%c1, %c0_13] : memref<8x4xf32, #tpu.memory_space<vmem>>, vector<1x4xf32>
    tpu.vector_store %arg3[%c1, %c0_13], %57 {strides = array<i32>} : memref<8x4xf32, #tpu.memory_space<vmem>>, vector<1x4xf32>,
    %59 = vector.extract_strided_slice %15 {offsets = [2, 0], sizes = [1, 4], strides = [1, 1]} : vector<8x4xf32> to vector<1x4xf32>
    %60 = vector.shape_cast %46 : vector<1x4xf32> to vector<1x1x4xf32>
    %61 = vector.broadcast %60 : vector<1x1x4xf32> to vector<1x4x4xf32>
    %62 = arith.mulf %61, %16 : vector<1x4x4xf32>
    %cst_14 = arith.constant dense<0.000000e+00> : vector<1x4xf32>
    %63 = vector.multi_reduction <add>, %62, %cst_14 [2] : vector<1x4x4xf32> to vector<1x4xf32>
    %64 = arith.addf %59, %63 : vector<1x4xf32>
    %65 = math.tanh %64 : vector<1x4xf32>
    %66 = vector.shape_cast %65 : vector<1x4xf32> to vector<1x1x4xf32>
    %67 = vector.broadcast %66 : vector<1x1x4xf32> to vector<1x4x4xf32>
    %68 = arith.mulf %67, %17 : vector<1x4x4xf32>
    %cst_15 = arith.constant dense<0.000000e+00> : vector<1x4xf32>
    %69 = vector.multi_reduction <add>, %68, %cst_15 [2] : vector<1x4x4xf32> to vector<1x4xf32>
    %70 = vector.shape_cast %57 : vector<1x4xf32> to vector<1x1x4xf32>
    %71 = vector.broadcast %70 : vector<1x1x4xf32> to vector<1x4x4xf32>
    %72 = arith.mulf %71, %18 : vector<1x4x4xf32>
    %cst_16 = arith.constant dense<0.000000e+00> : vector<1x4xf32>
    %73 = vector.multi_reduction <add>, %72, %cst_16 [2] : vector<1x4x4xf32> to vector<1x4xf32>
    %74 = arith.addf %69, %73 : vector<1x4xf32>
    %75 = arith.addf %74, %7 : vector<1x4xf32>
    %76 = math.tanh %75 : vector<1x4xf32>
    %c2 = arith.constant 2 : index
    %c0_17 = arith.constant 0 : index
    %77 = vector.load %arg3[%c2, %c0_17] : memref<8x4xf32, #tpu.memory_space<vmem>>, vector<1x4xf32>
    tpu.vector_store %arg3[%c2, %c0_17], %76 {strides = array<i32>} : memref<8x4xf32, #tpu.memory_space<vmem>>, vector<1x4xf32>,
    %78 = vector.extract_strided_slice %15 {offsets = [3, 0], sizes = [1, 4], strides = [1, 1]} : vector<8x4xf32> to vector<1x4xf32>
    %79 = vector.shape_cast %65 : vector<1x4xf32> to vector<1x1x4xf32>
    %80 = vector.broadcast %79 : vector<1x1x4xf32> to vector<1x4x4xf32>
    %81 = arith.mulf %80, %16 : vector<1x4x4xf32>
    %cst_18 = arith.constant dense<0.000000e+00> : vector<1x4xf32>
    %82 = vector.multi_reduction <add>, %81, %cst_18 [2] : vector<1x4x4xf32> to vector<1x4xf32>
    %83 = arith.addf %78, %82 : vector<1x4xf32>
    %84 = math.tanh %83 : vector<1x4xf32>
    %85 = vector.shape_cast %84 : vector<1x4xf32> to vector<1x1x4xf32>
    %86 = vector.broadcast %85 : vector<1x1x4xf32> to vector<1x4x4xf32>
    %87 = arith.mulf %86, %17 : vector<1x4x4xf32>
    %cst_19 = arith.constant dense<0.000000e+00> : vector<1x4xf32>
    %88 = vector.multi_reduction <add>, %87, %cst_19 [2] : vector<1x4x4xf32> to vector<1x4xf32>
    %89 = vector.shape_cast %76 : vector<1x4xf32> to vector<1x1x4xf32>
    %90 = vector.broadcast %89 : vector<1x1x4xf32> to vector<1x4x4xf32>
    %91 = arith.mulf %90, %18 : vector<1x4x4xf32>
    %cst_20 = arith.constant dense<0.000000e+00> : vector<1x4xf32>
    %92 = vector.multi_reduction <add>, %91, %cst_20 [2] : vector<1x4x4xf32> to vector<1x4xf32>
    %93 = arith.addf %88, %92 : vector<1x4xf32>
    %94 = arith.addf %93, %7 : vector<1x4xf32>
    %95 = math.tanh %94 : vector<1x4xf32>
    %c3 = arith.constant 3 : index
    %c0_21 = arith.constant 0 : index
    %96 = vector.load %arg3[%c3, %c0_21] : memref<8x4xf32, #tpu.memory_space<vmem>>, vector<1x4xf32>
    tpu.vector_store %arg3[%c3, %c0_21], %95 {strides = array<i32>} : memref<8x4xf32, #tpu.memory_space<vmem>>, vector<1x4xf32>,
    %97 = vector.extract_strided_slice %15 {offsets = [4, 0], sizes = [1, 4], strides = [1, 1]} : vector<8x4xf32> to vector<1x4xf32>
    %98 = vector.shape_cast %84 : vector<1x4xf32> to vector<1x1x4xf32>
    %99 = vector.broadcast %98 : vector<1x1x4xf32> to vector<1x4x4xf32>
    %100 = arith.mulf %99, %16 : vector<1x4x4xf32>
    %cst_22 = arith.constant dense<0.000000e+00> : vector<1x4xf32>
    %101 = vector.multi_reduction <add>, %100, %cst_22 [2] : vector<1x4x4xf32> to vector<1x4xf32>
    %102 = arith.addf %97, %101 : vector<1x4xf32>
    %103 = math.tanh %102 : vector<1x4xf32>
    %104 = vector.shape_cast %103 : vector<1x4xf32> to vector<1x1x4xf32>
    %105 = vector.broadcast %104 : vector<1x1x4xf32> to vector<1x4x4xf32>
    %106 = arith.mulf %105, %17 : vector<1x4x4xf32>
    %cst_23 = arith.constant dense<0.000000e+00> : vector<1x4xf32>
    %107 = vector.multi_reduction <add>, %106, %cst_23 [2] : vector<1x4x4xf32> to vector<1x4xf32>
    %108 = vector.shape_cast %95 : vector<1x4xf32> to vector<1x1x4xf32>
    %109 = vector.broadcast %108 : vector<1x1x4xf32> to vector<1x4x4xf32>
    %110 = arith.mulf %109, %18 : vector<1x4x4xf32>
    %cst_24 = arith.constant dense<0.000000e+00> : vector<1x4xf32>
    %111 = vector.multi_reduction <add>, %110, %cst_24 [2] : vector<1x4x4xf32> to vector<1x4xf32>
    %112 = arith.addf %107, %111 : vector<1x4xf32>
    %113 = arith.addf %112, %7 : vector<1x4xf32>
    %114 = math.tanh %113 : vector<1x4xf32>
    %c4 = arith.constant 4 : index
    %c0_25 = arith.constant 0 : index
    %115 = vector.load %arg3[%c4, %c0_25] : memref<8x4xf32, #tpu.memory_space<vmem>>, vector<1x4xf32>
    tpu.vector_store %arg3[%c4, %c0_25], %114 {strides = array<i32>} : memref<8x4xf32, #tpu.memory_space<vmem>>, vector<1x4xf32>,
    %116 = vector.extract_strided_slice %15 {offsets = [5, 0], sizes = [1, 4], strides = [1, 1]} : vector<8x4xf32> to vector<1x4xf32>
    %117 = vector.shape_cast %103 : vector<1x4xf32> to vector<1x1x4xf32>
    %118 = vector.broadcast %117 : vector<1x1x4xf32> to vector<1x4x4xf32>
    %119 = arith.mulf %118, %16 : vector<1x4x4xf32>
    %cst_26 = arith.constant dense<0.000000e+00> : vector<1x4xf32>
    %120 = vector.multi_reduction <add>, %119, %cst_26 [2] : vector<1x4x4xf32> to vector<1x4xf32>
    %121 = arith.addf %116, %120 : vector<1x4xf32>
    %122 = math.tanh %121 : vector<1x4xf32>
    %123 = vector.shape_cast %122 : vector<1x4xf32> to vector<1x1x4xf32>
    %124 = vector.broadcast %123 : vector<1x1x4xf32> to vector<1x4x4xf32>
    %125 = arith.mulf %124, %17 : vector<1x4x4xf32>
    %cst_27 = arith.constant dense<0.000000e+00> : vector<1x4xf32>
    %126 = vector.multi_reduction <add>, %125, %cst_27 [2] : vector<1x4x4xf32> to vector<1x4xf32>
    %127 = vector.shape_cast %114 : vector<1x4xf32> to vector<1x1x4xf32>
    %128 = vector.broadcast %127 : vector<1x1x4xf32> to vector<1x4x4xf32>
    %129 = arith.mulf %128, %18 : vector<1x4x4xf32>
    %cst_28 = arith.constant dense<0.000000e+00> : vector<1x4xf32>
    %130 = vector.multi_reduction <add>, %129, %cst_28 [2] : vector<1x4x4xf32> to vector<1x4xf32>
    %131 = arith.addf %126, %130 : vector<1x4xf32>
    %132 = arith.addf %131, %7 : vector<1x4xf32>
    %133 = math.tanh %132 : vector<1x4xf32>
    %c5 = arith.constant 5 : index
    %c0_29 = arith.constant 0 : index
    %134 = vector.load %arg3[%c5, %c0_29] : memref<8x4xf32, #tpu.memory_space<vmem>>, vector<1x4xf32>
    tpu.vector_store %arg3[%c5, %c0_29], %133 {strides = array<i32>} : memref<8x4xf32, #tpu.memory_space<vmem>>, vector<1x4xf32>,
    %135 = vector.extract_strided_slice %15 {offsets = [6, 0], sizes = [1, 4], strides = [1, 1]} : vector<8x4xf32> to vector<1x4xf32>
    %136 = vector.shape_cast %122 : vector<1x4xf32> to vector<1x1x4xf32>
    %137 = vector.broadcast %136 : vector<1x1x4xf32> to vector<1x4x4xf32>
    %138 = arith.mulf %137, %16 : vector<1x4x4xf32>
    %cst_30 = arith.constant dense<0.000000e+00> : vector<1x4xf32>
    %139 = vector.multi_reduction <add>, %138, %cst_30 [2] : vector<1x4x4xf32> to vector<1x4xf32>
    %140 = arith.addf %135, %139 : vector<1x4xf32>
    %141 = math.tanh %140 : vector<1x4xf32>
    %142 = vector.shape_cast %141 : vector<1x4xf32> to vector<1x1x4xf32>
    %143 = vector.broadcast %142 : vector<1x1x4xf32> to vector<1x4x4xf32>
    %144 = arith.mulf %143, %17 : vector<1x4x4xf32>
    %cst_31 = arith.constant dense<0.000000e+00> : vector<1x4xf32>
    %145 = vector.multi_reduction <add>, %144, %cst_31 [2] : vector<1x4x4xf32> to vector<1x4xf32>
    %146 = vector.shape_cast %133 : vector<1x4xf32> to vector<1x1x4xf32>
    %147 = vector.broadcast %146 : vector<1x1x4xf32> to vector<1x4x4xf32>
    %148 = arith.mulf %147, %18 : vector<1x4x4xf32>
    %cst_32 = arith.constant dense<0.000000e+00> : vector<1x4xf32>
    %149 = vector.multi_reduction <add>, %148, %cst_32 [2] : vector<1x4x4xf32> to vector<1x4xf32>
    %150 = arith.addf %145, %149 : vector<1x4xf32>
    %151 = arith.addf %150, %7 : vector<1x4xf32>
    %152 = math.tanh %151 : vector<1x4xf32>
    %c6 = arith.constant 6 : index
    %c0_33 = arith.constant 0 : index
    %153 = vector.load %arg3[%c6, %c0_33] : memref<8x4xf32, #tpu.memory_space<vmem>>, vector<1x4xf32>
    tpu.vector_store %arg3[%c6, %c0_33], %152 {strides = array<i32>} : memref<8x4xf32, #tpu.memory_space<vmem>>, vector<1x4xf32>,
    %154 = vector.extract_strided_slice %15 {offsets = [7, 0], sizes = [1, 4], strides = [1, 1]} : vector<8x4xf32> to vector<1x4xf32>
    %155 = vector.shape_cast %141 : vector<1x4xf32> to vector<1x1x4xf32>
    %156 = vector.broadcast %155 : vector<1x1x4xf32> to vector<1x4x4xf32>
    %157 = arith.mulf %156, %16 : vector<1x4x4xf32>
    %cst_34 = arith.constant dense<0.000000e+00> : vector<1x4xf32>
    %158 = vector.multi_reduction <add>, %157, %cst_34 [2] : vector<1x4x4xf32> to vector<1x4xf32>
    %159 = arith.addf %154, %158 : vector<1x4xf32>
    %160 = math.tanh %159 : vector<1x4xf32>
    %161 = vector.shape_cast %160 : vector<1x4xf32> to vector<1x1x4xf32>
    %162 = vector.broadcast %161 : vector<1x1x4xf32> to vector<1x4x4xf32>
    %163 = arith.mulf %162, %17 : vector<1x4x4xf32>
    %cst_35 = arith.constant dense<0.000000e+00> : vector<1x4xf32>
    %164 = vector.multi_reduction <add>, %163, %cst_35 [2] : vector<1x4x4xf32> to vector<1x4xf32>
    %165 = vector.shape_cast %152 : vector<1x4xf32> to vector<1x1x4xf32>
    %166 = vector.broadcast %165 : vector<1x1x4xf32> to vector<1x4x4xf32>
    %167 = arith.mulf %166, %18 : vector<1x4x4xf32>
    %cst_36 = arith.constant dense<0.000000e+00> : vector<1x4xf32>
    %168 = vector.multi_reduction <add>, %167, %cst_36 [2] : vector<1x4x4xf32> to vector<1x4xf32>
    %169 = arith.addf %164, %168 : vector<1x4xf32>
    %170 = arith.addf %169, %7 : vector<1x4xf32>
    %171 = math.tanh %170 : vector<1x4xf32>
    %c7 = arith.constant 7 : index
    %c0_37 = arith.constant 0 : index
    %172 = vector.load %arg3[%c7, %c0_37] : memref<8x4xf32, #tpu.memory_space<vmem>>, vector<1x4xf32>
    tpu.vector_store %arg3[%c7, %c0_37], %171 {strides = array<i32>} : memref<8x4xf32, #tpu.memory_space<vmem>>, vector<1x4xf32>,
    return
  }
  func.func @transform_0(%arg0: i32) -> (i32, i32) {
    %c0_i32 = arith.constant 0 : i32
    %c0_i32_0 = arith.constant 0 : i32
    %c0_i32_1 = arith.constant 0 : i32
    return %c0_i32, %c0_i32_0 : i32, i32
  }
  func.func @transform_1(%arg0: i32) -> (i32, i32) {
    %c0_i32 = arith.constant 0 : i32
    %c0_i32_0 = arith.constant 0 : i32
    %c0_i32_1 = arith.constant 0 : i32
    return %c0_i32, %c0_i32_0 : i32, i32
  }
  func.func @transform_2(%arg0: i32) -> (i32, i32) {
    %c0_i32 = arith.constant 0 : i32
    %c0_i32_0 = arith.constant 0 : i32
    %c0_i32_1 = arith.constant 0 : i32
    return %c0_i32, %c0_i32_0 : i32, i32
  }
}

</mosaic_0001>

<bundles_post_ra>
// kernel: tpu_custom_call.1
= control target key start
LH: loop header
LB: loop body
LE: loop exit
PB: predicated region body
PF: predicated region fallthrough
CT: control target
= control target key end

     0   :  { %v72_v0 = vlaneseq  ;;  %vm45_vm0 = vcmask 27648   ;;  %v1036_v57 = vmov 0   ;;  %vm156_vm1 = vcmask 1041409   ;;  %s1478_s0 = inlined_call_operand.vmem [shape: f32[8,4], index: 0, kind: input, shape index: {}]   ;;  %s1479_s1 = inlined_call_operand.vmem [shape: f32[8,128], index: 1, kind: input, shape index: {}]   ;;  %s1480_s2 = inlined_call_operand.vmem [shape: f32[8,4], index: 2, kind: output, shape index: {}]  }
   0x1   :  { %v11_v1 = vld [vmem:[%s1478_s0] sm:$0xff]  ;;  %s1034_s0 = smov 124   ;;  %vm158_vm2 = vcmask 1042434   ;;  %vm160_vm3 = vcmask 1043459   ;;  %vm189_vm4 = vcmask 24576  }
   0x2   :  { %v1058_v2 = vld [vmem:[%s1479_s1] sm:$0xff]  ;;  %v21_v3 = vperm.slane %v11_v1, 0  ;;  %v17_v4 = vrot.slane %v11_v1, 4  ;;  %v14_v5 = vrot.slane %v11_v1, 1  ;;  %v18_v6 = vrot.slane %v11_v1, 5  ;;  %s1035_s1 = smov 116  }
   0x3   :  { %v1061_v7 = vshrl.u32 %v72_v0, 7  ;;  %v19_v16 = vrot.slane %v11_v1, 6  ;;  %v15_v18 = vrot.slane %v11_v1, 2  ;;  %v16_v19 = vrot.slane %v11_v1, 3 }
   0x4   :  { %v37_v8 = vmul.f32 %v21_v3, %v1058_v2  ;;  %v25_v9 = vperm.slane %v17_v4, 0  ;;  %v22_v10 = vperm.slane %v14_v5, 0  ;;  %v26_v13 = vperm.slane %v18_v6, 0 }
   0x5   :  { %989 = vset.pattern.permute.xlu2 %v1061_v7  ;;  %v27_v21 = vperm.slane %v19_v16, 0  ;;  %v101_v22 = vadd.s32 8, %v1061_v7  ;;  %v23_v23 = vperm.slane %v15_v18, 0  ;;  %v24_v26 = vperm.slane %v16_v19, 0 }
   0x6   :  { %v46_v11 = vsel %vm45_vm0, %v37_v8, 0.0  ;;  %v41_v12 = vmul.f32 %v25_v9, %v1058_v2  ;;  %v38_v15 = vmul.f32 %v22_v10, %v1058_v2  ;;  %v42_v17 = vmul.f32 %v26_v13, %v1058_v2 }
   0x7   :  { %47 = vadd.xlane.f32.xlu0 %v46_v11  ;;  %990 = vset.pattern.permute.xlu1 %v101_v22  ;;  %v39_v25 = vmul.f32 %v23_v23, %v1058_v2  ;;  %v43_v27 = vmul.f32 %v27_v21, %v1058_v2  ;;  %v40_v29 = vmul.f32 %v24_v26, %v1058_v2  ;;  %v20_v30 = vrot.slane %v11_v1, 7 }
   0x8   :  { %v58_v14 = vsel %vm45_vm0, %v41_v12, 0.0  ;;  %v49_v20 = vsel %vm45_vm0, %v38_v15, 0.0  ;;  %v61_v24 = vsel %vm45_vm0, %v42_v17, 0.0  ;;  %992 = vset.pattern.permute.xlu0 %v101_v22  ;;  %v70_v36 = vperm.slane %v1058_v2, 4 }
   0x9   :  { %59 = vadd.xlane.f32.xlu2 %v58_v14  ;;  %v52_v28 = vsel %vm45_vm0, %v39_v25, 0.0  ;;  %v64_v31 = vsel %vm45_vm0, %v43_v27, 0.0  ;;  %v55_v32 = vsel %vm45_vm0, %v40_v29, 0.0  ;;  %v28_v33 = vperm.slane %v20_v30, 0 }
   0xa   :  { %53 = vadd.xlane.f32.xlu1 %v52_v28  ;;  %v87_v37 = vmul.f32 0.0, %v1058_v2  ;;  %v1084_v38 = vperm.slane %v1058_v2, 2  ;;  %v98_v39 = vperm.slane %v1058_v2, 0  ;;  %v176_v40 = vadd.s32 4, %v1061_v7 }
   0xb   :  { %v44_v34 = vmul.f32 %v28_v33, %v1058_v2  ;;  %v105_v41 = vperm.slane %v1058_v2, 1  ;;  %v1092_v42 = vperm.slane %v1058_v2, 3  ;;  %v285_v9 = vadd.s32 12, %v1061_v7 }
   0xc   :  { %v1148_v18 = vand.u32 127, %v72_v0 }
   0xd   :  { %v67_v35 = vsel %vm45_vm0, %v44_v34, 0.0 }
   0xf   :  { %50 = vadd.xlane.f32.xlu0 %v49_v20 }
  0x11   :  { %62 = vadd.xlane.f32.xlu2 %v61_v24 }
  0x12   :  { %56 = vadd.xlane.f32.xlu1 %v55_v32 }
  0x17   :  { %65 = vadd.xlane.f32.xlu0 %v64_v31 }
  0x1a   :  { %68 = vadd.xlane.f32.xlu1 %v67_v35 }
  0x29   :  { %76 = vperm.xlu2 %989, %v70_v36  }
  0x2b   :  { %89 = vrot.lane.b32.xlu0 %v87_v37, %s1034_s0 }
  0x31   :  { %991 = vset.pattern.permute.xlu2 %v101_v22 }
  0x33   :  { %117 = vperm.xlu0 %992, %v1084_v38   ;;  %103 = vperm.xlu1 %990, %v98_v39  }
  0x39   :  { %110 = vperm.xlu2 %991, %v105_v41  }
  0x3b   :  { %994 = vset.pattern.permute.xlu1 %v176_v40  ;;  %997 = vset.pattern.permute.xlu0 %v1036_v57 }
  0x41   :  { %124 = vperm.xlu2 %991, %v1092_v42  }
  0x43   :  { %207 = vperm.xlu1 %994, %v1084_v38  }
  0x49   :  { %993 = vset.pattern.permute.xlu2 %v176_v40 }
  0x4a   :  { %166 = vrot.lane.b32.xlu2 %v87_v37, %s1035_s1 }
  0x4b   :  { %996 = vset.pattern.permute.xlu1 %v1036_v57 }
  0x52   :  { %178 = vperm.xlu2 %993, %v70_v36  }
  0x5a   :  { %195 = vperm.xlu2 %993, %v98_v39  }
  0x62   :  { %201 = vperm.xlu2 %993, %v105_v41  }
  0x6a   :  { %213 = vperm.xlu2 %993, %v1092_v42  }
  0x72   :  { %995 = vset.pattern.permute.xlu2 %v1036_v57 }
  0x7a   :  { %v48_v43 = vpop.xlane.xlu0 %47 }
  0x7c   :  { %v1101_v48 = vpop.xlane.xlu2 %59 }
  0x7d   :  { %v1112_v55 = vpop.xlane.xlu1 %53 }
  0x82   :  { %v1095_v44 = vpop.xlane.xlu0 %50 }
  0x84   :  { %v1103_v49 = vpop.xlane.xlu2 %62 }
  0x85   :  { %v1114_v56 = vpop.xlane.xlu1 %56 }
  0x8a   :  { %v1097_v45 = vpop.xlane.xlu0 %65 }
  0x8c   :  { %v1105_v50 = vpop.permute.xlu2 %76 }
  0x8d   :  { %v1119_v58 = vpop.xlane.xlu1 %68  ;;  %v79_v61 = vadd.f32 %v1105_v50, %v48_v43 }
  0x94   :  { %v1107_v51 = vpop.permute.xlu2 %110 }
  0x9c   :  { %v1109_v52 = vpop.permute.xlu2 %124 }
  0x9d   :  { %v90_v46 = vpop.permute.xlu0 %89 }
  0x9e   :  { %v92_v47 = vsel %vm45_vm0, %v90_v46, 0.0 }
  0x9f   :  { %93 = vadd.xlane.f32.xlu1 %v92_v47 }
  0xa4   :  { %v167_v53 = vpop.permute.xlu2 %166 }
  0xa5   :  { %v169_v54 = vsel %vm45_vm0, %v167_v53, 0.0  ;;  %v1121_v59 = vpop.permute.xlu1 %103  ;;  %v1128_v2 = vpop.permute.xlu0 %117 }
  0xa6   :  { %170 = vadd.xlane.f32.xlu0 %v169_v54 }
  0xac   :  { %v1126_v1 = vpop.permute.xlu2 %178 }
  0xb4   :  { %v1133_v8 = vpop.permute.xlu2 %195 }
  0xb5   :  { %v1123_v60 = vpop.permute.xlu1 %207 }
  0xbc   :  { %v1138_v12 = vpop.permute.xlu2 %201 }
  0xc4   :  { %v1143_v7 = vpop.permute.xlu2 %213 }
 0x112   :  { %v94_v62 = vpop.xlane.xlu1 %93 }
 0x113   :  { %v95_v63 = vadd.f32 %v94_v62, %v79_v61  ;;  %v80_v62 = vadd.f32 %v1105_v50, %v1095_v44 }
 0x115   :  { %1002 = vtanh.f32 %v95_v63 }
 0x119   :  { %v171_v17 = vpop.xlane.xlu0 %170 }
 0x11b   :  { %v1003_v3 = vpop.eup %1002 }
 0x11c   :  { %v131_v4 = vmul.f32 %v1003_v3, %v1107_v51  ;;  %v130_v5 = vmul.f32 %v1003_v3, %v1121_v59  ;;  %v132_v6 = vmul.f32 %v1003_v3, %v1128_v2  ;;  %v133_v10 = vmul.f32 %v1003_v3, %v1109_v52 }
 0x11d   :  { %v219_v11 = vmul.f32 %v1003_v3, %v1133_v8  ;;  %v220_v13 = vmul.f32 %v1003_v3, %v1138_v12  ;;  %v221_v14 = vmul.f32 %v1003_v3, %v1123_v60  ;;  %v222_v15 = vmul.f32 %v1003_v3, %v1143_v7 }
 0x11e   :  { %142 = vperm.xlu1 %996, %v131_v4   ;;  %139 = vperm.xlu2 %995, %v130_v5  }
 0x11f   :  { %145 = vperm.xlu0 %997, %v132_v6  }
 0x126   :  { %998 = vset.pattern.permute.xlu1 %v285_v9  ;;  %148 = vperm.xlu2 %995, %v133_v10  }
 0x127   :  { %228 = vperm.xlu0 %997, %v219_v11  }
 0x12e   :  { %287 = vperm.xlu1 %998, %v98_v39   ;;  %231 = vperm.xlu2 %995, %v220_v13  }
 0x136   :  { %293 = vperm.xlu1 %998, %v105_v41   ;;  %234 = vperm.xlu2 %995, %v221_v14  }
 0x13e   :  { %299 = vperm.xlu1 %998, %v1084_v38   ;;  %1000 = vset.pattern.permute.xlu2 %v285_v9 }
 0x146   :  { %999 = vset.pattern.permute.xlu1 %v1036_v57 }
 0x147   :  { %237 = vperm.xlu1 %999, %v222_v15  }
 0x178   :  { %v140_v16 = vpop.permute.xlu2 %139 }
 0x179   :  { %v152_v21 = vperm.slane %v140_v16, %v1148_v18 }
 0x180   :  { %v149_v19 = vpop.permute.xlu2 %148 }
 0x181   :  { %v155_v25 = vperm.slane %v149_v19, %v1148_v18 }
 0x188   :  { %v232_v31 = vpop.permute.xlu2 %231 }
 0x189   :  { %v240_v35 = vperm.slane %v232_v31, %v1148_v18 }
 0x190   :  { %v143_v20 = vpop.permute.xlu1 %142  ;;  %v235_v36 = vpop.permute.xlu2 %234 }
 0x191   :  { %v153_v22 = vperm.slane %v143_v20, %v1148_v18  ;;  %v146_v23 = vpop.permute.xlu0 %145  ;;  %v241_v38 = vperm.slane %v235_v36, %v1148_v18 }
 0x192   :  { %v154_v24 = vperm.slane %v146_v23, %v1148_v18 }
 0x193   :  { %v157_v26 = vsel %vm156_vm1, %v153_v22, %v152_v21 }
 0x194   :  { %v159_v27 = vsel %vm158_vm2, %v154_v24, %v157_v26 }
 0x195   :  { %v161_v0 = vsel %vm160_vm3, %v155_v25, %v159_v27 }
 0x196   :  { %v163_v28 = vsel %vm45_vm0, %v161_v0, 0.0 }
 0x197   :  { %164 = vadd.xlane.f32.xlu1 %v163_v28 }
 0x199   :  { %v229_v33 = vpop.permute.xlu0 %228 }
 0x19a   :  { %v239_v34 = vperm.slane %v229_v33, %v1148_v18 }
 0x19c   :  { %v243_v37 = vsel %vm156_vm1, %v240_v35, %v239_v34 }
 0x19d   :  { %v244_v41 = vsel %vm158_vm2, %v241_v38, %v243_v37 }
 0x1a0   :  { %v1158_v29 = vpop.permute.xlu1 %287 }
 0x1a8   :  { %v1160_v30 = vpop.permute.xlu1 %293 }
 0x1b0   :  { %v1162_v32 = vpop.permute.xlu1 %299 }
 0x1b9   :  { %v238_v39 = vpop.permute.xlu1 %237 }
 0x1ba   :  { %v242_v40 = vperm.slane %v238_v39, %v1148_v18 }
 0x1bc   :  { %v245_v43 = vsel %vm160_vm3, %v242_v40, %v244_v41 }
 0x1bd   :  { %v247_v46 = vsel %vm45_vm0, %v245_v43, 0.0 }
 0x1be   :  { %248 = vadd.xlane.f32.xlu2 %v247_v46 }
 0x1d6   :  { %305 = vperm.xlu2 %1000, %v1092_v42  }
 0x1de   :  { %1001 = vset.pattern.permute.xlu2 %v1036_v57 }
 0x20a   :  { %v165_v47 = vpop.xlane.xlu1 %164 }
 0x20b   :  { %v172_v53 = vadd.f32 %v171_v17, %v165_v47 }
 0x20d   :  { %v181_v54 = vadd.f32 %v1126_v1, %v172_v53 }
 0x20f   :  { %1004 = vtanh.f32 %v181_v54 }
 0x215   :  { %v1005_v61 = vpop.eup %1004 }
 0x216   :  { %185 = vperm.xlu2 %1001, %v1005_v61   ;;  %v311_v10 = vmul.f32 %v1005_v61, %v1158_v29  ;;  %v313_v11 = vmul.f32 %v1005_v61, %v1162_v32  ;;  %v312_v13 = vmul.f32 %v1005_v61, %v1160_v30 }
 0x231   :  { %v249_v63 = vpop.xlane.xlu2 %248 }
 0x232   :  { %v250_v3 = vadd.f32 %v249_v63, %v80_v62 }
 0x234   :  { %1006 = vtanh.f32 %v250_v3 }
 0x239   :  { %v1187_v15 = vpop.permute.xlu2 %305 }
 0x23a   :  { %v1007_v4 = vpop.eup %1006  ;;  %v314_v16 = vmul.f32 %v1005_v61, %v1187_v15 }
 0x23b   :  { %v253_v5 = vmul.f32 %v1007_v4, %v1107_v51  ;;  %v252_v42 = vmul.f32 %v1007_v4, %v1121_v59  ;;  %v255_v57 = vmul.f32 %v1007_v4, %v1109_v52  ;;  %v254_v6 = vmul.f32 %v1007_v4, %v1128_v2 }
 0x23c   :  { %v352_v9 = vmul.f32 %v1007_v4, %v1133_v8  ;;  %v353_v44 = vmul.f32 %v1007_v4, %v1138_v12  ;;  %v355_v14 = vmul.f32 %v1007_v4, %v1143_v7  ;;  %v354_v17 = vmul.f32 %v1007_v4, %v1123_v60 }
 0x23d   :  { %264 = vperm.xlu1 %999, %v253_v5   ;;  %261 = vperm.xlu0 %997, %v252_v42  }
 0x245   :  { %270 = vperm.xlu1 %999, %v255_v57   ;;  %267 = vperm.xlu0 %997, %v254_v6  }
 0x24d   :  { %361 = vperm.xlu1 %999, %v352_v9   ;;  %364 = vperm.xlu0 %997, %v353_v44  }
 0x255   :  { %320 = vperm.xlu1 %999, %v311_v10   ;;  %326 = vperm.xlu0 %997, %v313_v11  }
 0x25d   :  { %323 = vperm.xlu1 %999, %v312_v13   ;;  %370 = vperm.xlu0 %997, %v355_v14  }
 0x265   :  { %329 = vperm.xlu1 %999, %v314_v16  }
 0x26d   :  { %367 = vperm.xlu1 %999, %v354_v17   ;;  %v81_v17 = vadd.f32 %v1105_v50, %v1112_v55 }
 0x270   :  { %v186_v19 = vpop.permute.xlu2 %185 }
 0x271   :  { %v187_v20 = vperm.slane %v186_v19, %v1148_v18 }
 0x273   :  { %190 = vst.msk [vmem:[%s1480_s2] sm:$0x1] %vm189_vm4, %v187_v20 }
 0x2af   :  { %v265_v21 = vpop.permute.xlu1 %264  ;;  %v262_v22 = vpop.permute.xlu0 %261 }
 0x2b0   :  { %v273_v23 = vperm.slane %v265_v21, %v1148_v18  ;;  %v272_v24 = vperm.slane %v262_v22, %v1148_v18 }
 0x2b2   :  { %v276_v28 = vsel %vm156_vm1, %v273_v23, %v272_v24 }
 0x2b7   :  { %v271_v25 = vpop.permute.xlu1 %270  ;;  %v268_v26 = vpop.permute.xlu0 %267 }
 0x2b8   :  { %v275_v27 = vperm.slane %v271_v25, %v1148_v18  ;;  %v274_v0 = vperm.slane %v268_v26, %v1148_v18 }
 0x2ba   :  { %v277_v31 = vsel %vm158_vm2, %v274_v0, %v276_v28 }
 0x2bb   :  { %v278_v33 = vsel %vm160_vm3, %v275_v27, %v277_v31 }
 0x2bc   :  { %v280_v34 = vsel %vm45_vm0, %v278_v33, 0.0 }
 0x2bd   :  { %281 = vadd.xlane.f32.xlu0 %v280_v34 }
 0x2bf   :  { %v362_v35 = vpop.permute.xlu1 %361  ;;  %v365_v37 = vpop.permute.xlu0 %364 }
 0x2c0   :  { %v372_v63 = vperm.slane %v362_v35, %v1148_v18  ;;  %v373_v3 = vperm.slane %v365_v37, %v1148_v18 }
 0x2c2   :  { %v376_v57 = vsel %vm156_vm1, %v373_v3, %v372_v63 }
 0x2c7   :  { %v321_v36 = vpop.permute.xlu1 %320  ;;  %v327_v41 = vpop.permute.xlu0 %326 }
 0x2c8   :  { %v331_v40 = vperm.slane %v321_v36, %v1148_v18  ;;  %v333_v46 = vperm.slane %v327_v41, %v1148_v18 }
 0x2cf   :  { %v324_v38 = vpop.permute.xlu1 %323  ;;  %v371_v4 = vpop.permute.xlu0 %370 }
 0x2d0   :  { %v332_v39 = vperm.slane %v324_v38, %v1148_v18  ;;  %v375_v6 = vperm.slane %v371_v4, %v1148_v18 }
 0x2d2   :  { %v335_v43 = vsel %vm156_vm1, %v332_v39, %v331_v40 }
 0x2d3   :  { %v336_v54 = vsel %vm158_vm2, %v333_v46, %v335_v43 }
 0x2d7   :  { %v330_v47 = vpop.permute.xlu1 %329 }
 0x2d8   :  { %v334_v53 = vperm.slane %v330_v47, %v1148_v18 }
 0x2da   :  { %v337_v61 = vsel %vm160_vm3, %v334_v53, %v336_v54 }
 0x2db   :  { %v339_v62 = vsel %vm45_vm0, %v337_v61, 0.0 }
 0x2dc   :  { %340 = vadd.xlane.f32.xlu2 %v339_v62 }
 0x2df   :  { %v368_v5 = vpop.permute.xlu1 %367 }
 0x2e0   :  { %v374_v42 = vperm.slane %v368_v5, %v1148_v18 }
 0x2e2   :  { %v377_v9 = vsel %vm158_vm2, %v374_v42, %v376_v57 }
 0x2e3   :  { %v378_v44 = vsel %vm160_vm3, %v375_v6, %v377_v9 }
 0x2e4   :  { %v380_v10 = vsel %vm45_vm0, %v378_v44, 0.0 }
 0x2e5   :  { %381 = vadd.xlane.f32.xlu1 %v380_v10 }
 0x330   :  { %v282_v11 = vpop.xlane.xlu0 %281 }
 0x34f   :  { %v341_v13 = vpop.xlane.xlu2 %340 }
 0x350   :  { %v342_v14 = vadd.f32 %v341_v13, %v282_v11 }
 0x352   :  { %v343_v16 = vadd.f32 %v342_v14, %v1126_v1 }
 0x354   :  { %1008 = vtanh.f32 %v343_v16 }
 0x358   :  { %v382_v19 = vpop.xlane.xlu1 %381 }
 0x359   :  { %v383_v20 = vadd.f32 %v382_v19, %v81_v17 }
 0x35a   :  { %v1009_v21 = vpop.eup %1008 }
 0x35b   :  { %1010 = vtanh.f32 %v383_v20  ;;  %347 = vperm.xlu1 %999, %v1009_v21   ;;  %v417_v23 = vmul.f32 %v1009_v21, %v1160_v30  ;;  %v416_v55 = vmul.f32 %v1009_v21, %v1158_v29  ;;  %v418_v31 = vmul.f32 %v1009_v21, %v1162_v32 }
 0x35c   :  { %v419_v34 = vmul.f32 %v1009_v21, %v1187_v15 }
 0x361   :  { %v1011_v22 = vpop.eup %1010 }
 0x362   :  { %v387_v24 = vmul.f32 %v1011_v22, %v1128_v2  ;;  %v385_v25 = vmul.f32 %v1011_v22, %v1121_v59  ;;  %v458_v26 = vmul.f32 %v1011_v22, %v1138_v12  ;;  %v386_v27 = vmul.f32 %v1011_v22, %v1107_v51 }
 0x363   :  { %428 = vperm.xlu1 %999, %v417_v23   ;;  %v459_v0 = vmul.f32 %v1011_v22, %v1123_v60  ;;  %v388_v28 = vmul.f32 %v1011_v22, %v1109_v52  ;;  %v457_v33 = vmul.f32 %v1011_v22, %v1133_v8  ;;  %v460_v35 = vmul.f32 %v1011_v22, %v1143_v7 }
 0x364   :  { %400 = vperm.xlu2 %1001, %v387_v24   ;;  %394 = vperm.xlu0 %997, %v385_v25  }
 0x36b   :  { %469 = vperm.xlu1 %999, %v458_v26  }
 0x36c   :  { %397 = vperm.xlu0 %997, %v386_v27   ;;  %425 = vperm.xlu2 %1001, %v416_v55  }
 0x373   :  { %472 = vperm.xlu1 %999, %v459_v0   ;;  %v82_v0 = vadd.f32 %v1105_v50, %v1114_v56 }
 0x374   :  { %403 = vperm.xlu0 %997, %v388_v28   ;;  %431 = vperm.xlu2 %1001, %v418_v31  }
 0x37c   :  { %466 = vperm.xlu0 %997, %v457_v33   ;;  %434 = vperm.xlu2 %1001, %v419_v34  }
 0x384   :  { %475 = vperm.xlu0 %997, %v460_v35  }
 0x3be   :  { %v401_v36 = vpop.permute.xlu2 %400 }
 0x3bf   :  { %v407_v9 = vperm.slane %v401_v36, %v1148_v18 }
 0x3c6   :  { %v426_v37 = vpop.permute.xlu2 %425 }
 0x3c7   :  { %v436_v43 = vperm.slane %v426_v37, %v1148_v18 }
 0x3cd   :  { %v348_v38 = vpop.permute.xlu1 %347 }
 0x3ce   :  { %v349_v39 = vperm.slane %v348_v38, %v1148_v18  ;;  %v432_v40 = vpop.permute.xlu2 %431 }
 0x3cf   :  { %v438_v54 = vperm.slane %v432_v40, %v1148_v18 }
 0x3d0   :  { %351 = vst.msk [vmem:[%s1480_s2 + $0x1] sm:$0x1] %vm189_vm4, %v349_v39 }
 0x3d5   :  { %v429_v41 = vpop.permute.xlu1 %428 }
 0x3d6   :  { %v437_v46 = vperm.slane %v429_v41, %v1148_v18  ;;  %v395_v47 = vpop.permute.xlu0 %394  ;;  %v435_v53 = vpop.permute.xlu2 %434 }
 0x3d7   :  { %v439_v61 = vperm.slane %v435_v53, %v1148_v18  ;;  %v405_v57 = vperm.slane %v395_v47, %v1148_v18 }
 0x3d8   :  { %v440_v62 = vsel %vm156_vm1, %v437_v46, %v436_v43 }
 0x3d9   :  { %v441_v63 = vsel %vm158_vm2, %v438_v54, %v440_v62 }
 0x3da   :  { %v442_v3 = vsel %vm160_vm3, %v439_v61, %v441_v63 }
 0x3db   :  { %v444_v4 = vsel %vm45_vm0, %v442_v3, 0.0 }
 0x3dc   :  { %445 = vadd.xlane.f32.xlu2 %v444_v4 }
 0x3dd   :  { %v470_v13 = vpop.permute.xlu1 %469 }
 0x3de   :  { %v398_v5 = vpop.permute.xlu0 %397  ;;  %v478_v20 = vperm.slane %v470_v13, %v1148_v18 }
 0x3df   :  { %v406_v42 = vperm.slane %v398_v5, %v1148_v18 }
 0x3e1   :  { %v409_v6 = vsel %vm156_vm1, %v406_v42, %v405_v57 }
 0x3e2   :  { %v410_v11 = vsel %vm158_vm2, %v407_v9, %v409_v6 }
 0x3e5   :  { %v473_v21 = vpop.permute.xlu1 %472 }
 0x3e6   :  { %v404_v44 = vpop.permute.xlu0 %403  ;;  %v479_v23 = vperm.slane %v473_v21, %v1148_v18 }
 0x3e7   :  { %v408_v10 = vperm.slane %v404_v44, %v1148_v18 }
 0x3e9   :  { %v411_v14 = vsel %vm160_vm3, %v408_v10, %v410_v11 }
 0x3ea   :  { %v413_v16 = vsel %vm45_vm0, %v411_v14, 0.0 }
 0x3eb   :  { %414 = vadd.xlane.f32.xlu0 %v413_v16 }
 0x3ee   :  { %v467_v17 = vpop.permute.xlu0 %466 }
 0x3ef   :  { %v477_v19 = vperm.slane %v467_v17, %v1148_v18 }
 0x3f1   :  { %v481_v22 = vsel %vm156_vm1, %v478_v20, %v477_v19 }
 0x3f2   :  { %v482_v26 = vsel %vm158_vm2, %v479_v23, %v481_v22 }
 0x3f6   :  { %v476_v24 = vpop.permute.xlu0 %475 }
 0x3f7   :  { %v480_v25 = vperm.slane %v476_v24, %v1148_v18 }
 0x3f9   :  { %v483_v27 = vsel %vm160_vm3, %v480_v25, %v482_v26 }
 0x3fa   :  { %v485_v55 = vsel %vm45_vm0, %v483_v27, 0.0 }
 0x3fb   :  { %486 = vadd.xlane.f32.xlu1 %v485_v55 }
 0x44f   :  { %v446_v33 = vpop.xlane.xlu2 %445 }
 0x45e   :  { %v415_v28 = vpop.xlane.xlu0 %414 }
 0x45f   :  { %v447_v35 = vadd.f32 %v446_v33, %v415_v28 }
 0x461   :  { %v448_v36 = vadd.f32 %v447_v35, %v1126_v1 }
 0x46e   :  { %v487_v31 = vpop.xlane.xlu1 %486 }
 0x46f   :  { %v488_v34 = vadd.f32 %v487_v31, %v82_v0 }
 0x471   :  { %1012 = vtanh.f32 %v488_v34 }
 0x472   :  { %1014 = vtanh.f32 %v448_v36 }
 0x477   :  { %v1013_v37 = vpop.eup %1012 }
 0x478   :  { %v563_v38 = vmul.f32 %v1013_v37, %v1138_v12  ;;  %v490_v39 = vmul.f32 %v1013_v37, %v1121_v59  ;;  %v491_v40 = vmul.f32 %v1013_v37, %v1107_v51  ;;  %v1015_v56 = vpop.eup %1014  ;;  %v564_v41 = vmul.f32 %v1013_v37, %v1123_v60 }
 0x479   :  { %v492_v43 = vmul.f32 %v1013_v37, %v1128_v2  ;;  %v521_v46 = vmul.f32 %v1015_v56, %v1158_v29  ;;  %v493_v47 = vmul.f32 %v1013_v37, %v1109_v52  ;;  %v523_v53 = vmul.f32 %v1015_v56, %v1162_v32 }
 0x47a   :  { %574 = vperm.xlu1 %999, %v563_v38   ;;  %499 = vperm.xlu0 %997, %v490_v39   ;;  %v562_v54 = vmul.f32 %v1013_v37, %v1133_v8  ;;  %v522_v61 = vmul.f32 %v1015_v56, %v1160_v30  ;;  %v524_v62 = vmul.f32 %v1015_v56, %v1187_v15 }
 0x47b   :  { %502 = vperm.xlu2 %1001, %v491_v40   ;;  %v565_v63 = vmul.f32 %v1013_v37, %v1143_v7 }
 0x482   :  { %577 = vperm.xlu1 %999, %v564_v41   ;;  %505 = vperm.xlu0 %997, %v492_v43  }
 0x483   :  { %530 = vperm.xlu2 %1001, %v521_v46  }
 0x48a   :  { %508 = vperm.xlu0 %997, %v493_v47   ;;  %452 = vperm.xlu1 %999, %v1015_v56  }
 0x48b   :  { %536 = vperm.xlu2 %1001, %v523_v53   ;;  %v83_v53 = vadd.f32 %v1105_v50, %v1101_v48 }
 0x492   :  { %571 = vperm.xlu0 %997, %v562_v54   ;;  %533 = vperm.xlu1 %999, %v522_v61  }
 0x493   :  { %539 = vperm.xlu2 %1001, %v524_v62  }
 0x49a   :  { %580 = vperm.xlu1 %999, %v565_v63  }
 0x4d5   :  { %v503_v3 = vpop.permute.xlu2 %502 }
 0x4d6   :  { %v511_v11 = vperm.slane %v503_v3, %v1148_v18 }
 0x4dd   :  { %v531_v42 = vpop.permute.xlu2 %530 }
 0x4de   :  { %v541_v26 = vperm.slane %v531_v42, %v1148_v18 }
 0x4e5   :  { %v537_v9 = vpop.permute.xlu2 %536 }
 0x4e6   :  { %v543_v55 = vperm.slane %v537_v9, %v1148_v18 }
 0x4ec   :  { %v575_v4 = vpop.permute.xlu1 %574  ;;  %v500_v5 = vpop.permute.xlu0 %499 }
 0x4ed   :  { %v510_v44 = vperm.slane %v500_v5, %v1148_v18  ;;  %v540_v23 = vpop.permute.xlu2 %539  ;;  %v583_v34 = vperm.slane %v575_v4, %v1148_v18 }
 0x4ee   :  { %v544_v0 = vperm.slane %v540_v23, %v1148_v18 }
 0x4ef   :  { %v514_v16 = vsel %vm156_vm1, %v511_v11, %v510_v44 }
 0x4f4   :  { %v578_v57 = vpop.permute.xlu1 %577  ;;  %v506_v6 = vpop.permute.xlu0 %505 }
 0x4f5   :  { %v512_v10 = vperm.slane %v506_v6, %v1148_v18  ;;  %v584_v38 = vperm.slane %v578_v57, %v1148_v18 }
 0x4f7   :  { %v515_v20 = vsel %vm158_vm2, %v512_v10, %v514_v16 }
 0x4fc   :  { %v509_v13 = vpop.permute.xlu0 %508  ;;  %v453_v14 = vpop.permute.xlu1 %452 }
 0x4fd   :  { %v513_v17 = vperm.slane %v509_v13, %v1148_v18  ;;  %v454_v19 = vperm.slane %v453_v14, %v1148_v18 }
 0x4ff   :  { %456 = vst.msk [vmem:[%s1480_s2 + $0x2] sm:$0x1] %vm189_vm4, %v454_v19  ;;  %v516_v21 = vsel %vm160_vm3, %v513_v17, %v515_v20 }
 0x500   :  { %v518_v22 = vsel %vm45_vm0, %v516_v21, 0.0 }
 0x501   :  { %519 = vadd.xlane.f32.xlu0 %v518_v22 }
 0x504   :  { %v572_v24 = vpop.permute.xlu0 %571  ;;  %v534_v25 = vpop.permute.xlu1 %533 }
 0x505   :  { %v542_v27 = vperm.slane %v534_v25, %v1148_v18  ;;  %v582_v28 = vperm.slane %v572_v24, %v1148_v18 }
 0x507   :  { %v545_v31 = vsel %vm156_vm1, %v542_v27, %v541_v26  ;;  %v586_v37 = vsel %vm156_vm1, %v583_v34, %v582_v28 }
 0x508   :  { %v546_v33 = vsel %vm158_vm2, %v543_v55, %v545_v31  ;;  %v587_v56 = vsel %vm158_vm2, %v584_v38, %v586_v37 }
 0x509   :  { %v547_v35 = vsel %vm160_vm3, %v544_v0, %v546_v33 }
 0x50a   :  { %v549_v36 = vsel %vm45_vm0, %v547_v35, 0.0 }
 0x50b   :  { %550 = vadd.xlane.f32.xlu2 %v549_v36 }
 0x50c   :  { %v581_v39 = vpop.permute.xlu1 %580 }
 0x50d   :  { %v585_v40 = vperm.slane %v581_v39, %v1148_v18 }
 0x50f   :  { %v588_v41 = vsel %vm160_vm3, %v585_v40, %v587_v56 }
 0x510   :  { %v590_v43 = vsel %vm45_vm0, %v588_v41, 0.0 }
 0x511   :  { %591 = vadd.xlane.f32.xlu0 %v590_v43 }
 0x574   :  { %v520_v46 = vpop.xlane.xlu0 %519 }
 0x57e   :  { %v551_v47 = vpop.xlane.xlu2 %550 }
 0x57f   :  { %v552_v62 = vadd.f32 %v551_v47, %v520_v46 }
 0x581   :  { %v553_v63 = vadd.f32 %v552_v62, %v1126_v1 }
 0x584   :  { %v592_v54 = vpop.xlane.xlu0 %591 }
 0x585   :  { %v593_v61 = vadd.f32 %v592_v54, %v83_v53 }
 0x587   :  { %1016 = vtanh.f32 %v593_v61 }
 0x588   :  { %1018 = vtanh.f32 %v553_v63 }
 0x58d   :  { %v1017_v3 = vpop.eup %1016 }
 0x58e   :  { %v667_v4 = vmul.f32 %v1017_v3, %v1133_v8  ;;  %v595_v5 = vmul.f32 %v1017_v3, %v1121_v59  ;;  %v596_v42 = vmul.f32 %v1017_v3, %v1107_v51  ;;  %v1019_v57 = vpop.eup %1018  ;;  %v669_v48 = vmul.f32 %v1017_v3, %v1123_v60 }
 0x58f   :  { %v597_v6 = vmul.f32 %v1017_v3, %v1128_v2  ;;  %v626_v9 = vmul.f32 %v1019_v57, %v1158_v29  ;;  %v598_v44 = vmul.f32 %v1017_v3, %v1109_v52  ;;  %v628_v10 = vmul.f32 %v1019_v57, %v1162_v32 }
 0x590   :  { %676 = vperm.xlu0 %997, %v667_v4   ;;  %604 = vperm.xlu1 %999, %v595_v5   ;;  %v627_v11 = vmul.f32 %v1019_v57, %v1160_v30  ;;  %v668_v13 = vmul.f32 %v1017_v3, %v1138_v12  ;;  %v670_v14 = vmul.f32 %v1017_v3, %v1143_v7 }
 0x591   :  { %607 = vperm.xlu2 %1001, %v596_v42   ;;  %v629_v16 = vmul.f32 %v1019_v57, %v1187_v15 }
 0x598   :  { %682 = vperm.xlu0 %997, %v669_v48   ;;  %610 = vperm.xlu1 %999, %v597_v6  }
 0x599   :  { %635 = vperm.xlu2 %1001, %v626_v9  }
 0x5a0   :  { %613 = vperm.xlu1 %999, %v598_v44   ;;  %641 = vperm.xlu0 %997, %v628_v10  }
 0x5a1   :  { %638 = vperm.xlu2 %1001, %v627_v11   ;;  %v84_v11 = vadd.f32 %v1105_v50, %v1103_v49 }
 0x5a8   :  { %679 = vperm.xlu1 %999, %v668_v13   ;;  %685 = vperm.xlu0 %997, %v670_v14  }
 0x5a9   :  { %644 = vperm.xlu2 %1001, %v629_v16  }
 0x5b0   :  { %557 = vperm.xlu1 %999, %v1019_v57  }
 0x5eb   :  { %v608_v17 = vpop.permute.xlu2 %607 }
 0x5ec   :  { %v616_v55 = vperm.slane %v608_v17, %v1148_v18 }
 0x5f3   :  { %v636_v19 = vpop.permute.xlu2 %635 }
 0x5f4   :  { %v646_v28 = vperm.slane %v636_v19, %v1148_v18 }
 0x5fb   :  { %v639_v22 = vpop.permute.xlu2 %638 }
 0x5fc   :  { %v647_v26 = vperm.slane %v639_v22, %v1148_v18 }
 0x5fe   :  { %v650_v37 = vsel %vm156_vm1, %v647_v26, %v646_v28 }
 0x602   :  { %v677_v20 = vpop.permute.xlu0 %676  ;;  %v605_v21 = vpop.permute.xlu1 %604 }
 0x603   :  { %v615_v25 = vperm.slane %v605_v21, %v1148_v18  ;;  %v645_v0 = vpop.permute.xlu2 %644  ;;  %v687_v54 = vperm.slane %v677_v20, %v1148_v18 }
 0x604   :  { %v649_v38 = vperm.slane %v645_v0, %v1148_v18 }
 0x605   :  { %v619_v34 = vsel %vm156_vm1, %v616_v55, %v615_v25 }
 0x60a   :  { %v683_v23 = vpop.permute.xlu0 %682  ;;  %v611_v24 = vpop.permute.xlu1 %610 }
 0x60b   :  { %v617_v27 = vperm.slane %v611_v24, %v1148_v18  ;;  %v689_v62 = vperm.slane %v683_v23, %v1148_v18 }
 0x60d   :  { %v620_v39 = vsel %vm158_vm2, %v617_v27, %v619_v34 }
 0x612   :  { %v614_v31 = vpop.permute.xlu1 %613  ;;  %v642_v33 = vpop.permute.xlu0 %641 }
 0x613   :  { %v618_v35 = vperm.slane %v614_v31, %v1148_v18  ;;  %v648_v36 = vperm.slane %v642_v33, %v1148_v18 }
 0x615   :  { %v621_v40 = vsel %vm160_vm3, %v618_v35, %v620_v39  ;;  %v651_v56 = vsel %vm158_vm2, %v648_v36, %v650_v37 }
 0x616   :  { %v623_v41 = vsel %vm45_vm0, %v621_v40, 0.0  ;;  %v652_v43 = vsel %vm160_vm3, %v649_v38, %v651_v56 }
 0x617   :  { %624 = vadd.xlane.f32.xlu1 %v623_v41  ;;  %v654_v46 = vsel %vm45_vm0, %v652_v43, 0.0 }
 0x618   :  { %655 = vadd.xlane.f32.xlu2 %v654_v46 }
 0x61a   :  { %v680_v47 = vpop.permute.xlu1 %679  ;;  %v686_v53 = vpop.permute.xlu0 %685 }
 0x61b   :  { %v688_v61 = vperm.slane %v680_v47, %v1148_v18  ;;  %v690_v3 = vperm.slane %v686_v53, %v1148_v18 }
 0x61d   :  { %v691_v63 = vsel %vm156_vm1, %v688_v61, %v687_v54 }
 0x61e   :  { %v692_v4 = vsel %vm158_vm2, %v689_v62, %v691_v63 }
 0x61f   :  { %v693_v5 = vsel %vm160_vm3, %v690_v3, %v692_v4 }
 0x620   :  { %v695_v42 = vsel %vm45_vm0, %v693_v5, 0.0 }
 0x621   :  { %696 = vadd.xlane.f32.xlu0 %v695_v42 }
 0x622   :  { %v558_v57 = vpop.permute.xlu1 %557 }
 0x623   :  { %v559_v48 = vperm.slane %v558_v57, %v1148_v18 }
 0x625   :  { %561 = vst.msk [vmem:[%s1480_s2 + $0x3] sm:$0x1] %vm189_vm4, %v559_v48 }
 0x68a   :  { %v625_v6 = vpop.xlane.xlu1 %624 }
 0x68b   :  { %v656_v9 = vpop.xlane.xlu2 %655 }
 0x68c   :  { %v657_v44 = vadd.f32 %v656_v9, %v625_v6 }
 0x68e   :  { %v658_v10 = vadd.f32 %v657_v44, %v1126_v1 }
 0x690   :  { %1020 = vtanh.f32 %v658_v10 }
 0x694   :  { %v697_v13 = vpop.xlane.xlu0 %696 }
 0x695   :  { %v698_v14 = vadd.f32 %v697_v13, %v84_v11 }
 0x696   :  { %v1021_v16 = vpop.eup %1020 }
 0x697   :  { %1022 = vtanh.f32 %v698_v14  ;;  %662 = vperm.xlu0 %997, %v1021_v16   ;;  %v733_v19 = vmul.f32 %v1021_v16, %v1162_v32  ;;  %v731_v26 = vmul.f32 %v1021_v16, %v1158_v29  ;;  %v732_v27 = vmul.f32 %v1021_v16, %v1160_v30 }
 0x698   :  { %v734_v55 = vmul.f32 %v1021_v16, %v1187_v15 }
 0x69d   :  { %v1023_v17 = vpop.eup %1022 }
 0x69e   :  { %v700_v20 = vmul.f32 %v1023_v17, %v1121_v59  ;;  %v701_v21 = vmul.f32 %v1023_v17, %v1107_v51  ;;  %v774_v22 = vmul.f32 %v1023_v17, %v1123_v60  ;;  %v702_v23 = vmul.f32 %v1023_v17, %v1128_v2 }
 0x69f   :  { %746 = vperm.xlu0 %997, %v733_v19   ;;  %v772_v49 = vmul.f32 %v1023_v17, %v1133_v8  ;;  %v703_v24 = vmul.f32 %v1023_v17, %v1109_v52  ;;  %v773_v25 = vmul.f32 %v1023_v17, %v1138_v12  ;;  %v775_v0 = vmul.f32 %v1023_v17, %v1143_v7 }
 0x6a0   :  { %709 = vperm.xlu1 %999, %v700_v20   ;;  %712 = vperm.xlu2 %1001, %v701_v21  }
 0x6a7   :  { %787 = vperm.xlu0 %997, %v774_v22  }
 0x6a8   :  { %715 = vperm.xlu1 %999, %v702_v23   ;;  %781 = vperm.xlu2 %1001, %v772_v49   ;;  %v85_v23 = vadd.f32 %v1105_v50, %v1097_v45 }
 0x6b0   :  { %718 = vperm.xlu1 %999, %v703_v24   ;;  %784 = vperm.xlu2 %1001, %v773_v25  }
 0x6b8   :  { %740 = vperm.xlu2 %1001, %v731_v26  }
 0x6c0   :  { %743 = vperm.xlu2 %1001, %v732_v27  }
 0x6c8   :  { %749 = vperm.xlu2 %1001, %v734_v55  }
 0x6d0   :  { %790 = vperm.xlu2 %1001, %v775_v0  }
 0x6fa   :  { %v713_v28 = vpop.permute.xlu2 %712 }
 0x6fb   :  { %v721_v43 = vperm.slane %v713_v28, %v1148_v18 }
 0x702   :  { %v782_v31 = vpop.permute.xlu2 %781 }
 0x703   :  { %v792_v44 = vperm.slane %v782_v31, %v1148_v18 }
 0x709   :  { %v663_v33 = vpop.permute.xlu0 %662 }
 0x70a   :  { %v664_v34 = vperm.slane %v663_v33, %v1148_v18  ;;  %v785_v35 = vpop.permute.xlu2 %784 }
 0x70b   :  { %v793_v42 = vperm.slane %v785_v35, %v1148_v18 }
 0x70c   :  { %666 = vst.msk [vmem:[%s1480_s2 + $0x4] sm:$0x1] %vm189_vm4, %v664_v34 }
 0x70d   :  { %v796_v13 = vsel %vm156_vm1, %v793_v42, %v792_v44 }
 0x711   :  { %v747_v40 = vpop.permute.xlu0 %746 }
 0x712   :  { %v710_v36 = vpop.permute.xlu1 %709  ;;  %v741_v37 = vpop.permute.xlu2 %740  ;;  %v753_v6 = vperm.slane %v747_v40, %v1148_v18 }
 0x713   :  { %v720_v56 = vperm.slane %v710_v36, %v1148_v18  ;;  %v751_v63 = vperm.slane %v741_v37, %v1148_v18 }
 0x715   :  { %v724_v53 = vsel %vm156_vm1, %v721_v43, %v720_v56 }
 0x719   :  { %v788_v3 = vpop.permute.xlu0 %787 }
 0x71a   :  { %v716_v38 = vpop.permute.xlu1 %715  ;;  %v744_v39 = vpop.permute.xlu2 %743  ;;  %v794_v9 = vperm.slane %v788_v3, %v1148_v18 }
 0x71b   :  { %v722_v41 = vperm.slane %v716_v38, %v1148_v18  ;;  %v752_v54 = vperm.slane %v744_v39, %v1148_v18 }
 0x71c   :  { %v797_v17 = vsel %vm158_vm2, %v794_v9, %v796_v13 }
 0x71d   :  { %v725_v62 = vsel %vm158_vm2, %v722_v41, %v724_v53  ;;  %v755_v57 = vsel %vm156_vm1, %v752_v54, %v751_v63 }
 0x71e   :  { %v756_v11 = vsel %vm158_vm2, %v753_v6, %v755_v57 }
 0x722   :  { %v719_v46 = vpop.permute.xlu1 %718  ;;  %v750_v47 = vpop.permute.xlu2 %749 }
 0x723   :  { %v723_v61 = vperm.slane %v719_v46, %v1148_v18  ;;  %v754_v48 = vperm.slane %v750_v47, %v1148_v18 }
 0x725   :  { %v726_v4 = vsel %vm160_vm3, %v723_v61, %v725_v62  ;;  %v757_v16 = vsel %vm160_vm3, %v754_v48, %v756_v11 }
 0x726   :  { %v728_v5 = vsel %vm45_vm0, %v726_v4, 0.0  ;;  %v759_v20 = vsel %vm45_vm0, %v757_v16, 0.0 }
 0x727   :  { %729 = vadd.xlane.f32.xlu1 %v728_v5 }
 0x72a   :  { %v791_v10 = vpop.permute.xlu2 %790 }
 0x72b   :  { %v795_v14 = vperm.slane %v791_v10, %v1148_v18 }
 0x72d   :  { %v798_v19 = vsel %vm160_vm3, %v795_v14, %v797_v17 }
 0x72e   :  { %v800_v21 = vsel %vm45_vm0, %v798_v19, 0.0 }
 0x72f   :  { %760 = vadd.xlane.f32.xlu1 %v759_v20  ;;  %801 = vadd.xlane.f32.xlu0 %v800_v21 }
 0x79a   :  { %v730_v22 = vpop.xlane.xlu1 %729 }
 0x7a2   :  { %v761_v49 = vpop.xlane.xlu1 %760  ;;  %v802_v24 = vpop.xlane.xlu0 %801 }
 0x7a3   :  { %v762_v25 = vadd.f32 %v761_v49, %v730_v22  ;;  %v803_v26 = vadd.f32 %v802_v24, %v85_v23 }
 0x7a5   :  { %1024 = vtanh.f32 %v803_v26  ;;  %v763_v27 = vadd.f32 %v762_v25, %v1126_v1 }
 0x7a7   :  { %1026 = vtanh.f32 %v763_v27 }
 0x7ab   :  { %v1025_v55 = vpop.eup %1024 }
 0x7ac   :  { %v878_v0 = vmul.f32 %v1025_v55, %v1138_v12  ;;  %v806_v28 = vmul.f32 %v1025_v55, %v1107_v51  ;;  %v805_v31 = vmul.f32 %v1025_v55, %v1121_v59  ;;  %v807_v34 = vmul.f32 %v1025_v55, %v1128_v2 }
 0x7ad   :  { %v1027_v33 = vpop.eup %1026  ;;  %v880_v35 = vmul.f32 %v1025_v55, %v1143_v7  ;;  %v808_v36 = vmul.f32 %v1025_v55, %v1109_v52  ;;  %v877_v12 = vmul.f32 %v1025_v55, %v1133_v8  ;;  %v879_v40 = vmul.f32 %v1025_v55, %v1123_v60 }
 0x7ae   :  { %889 = vperm.xlu0 %997, %v878_v0   ;;  %817 = vperm.xlu2 %1001, %v806_v28   ;;  %v837_v45 = vmul.f32 %v1027_v33, %v1160_v30  ;;  %v836_v37 = vmul.f32 %v1027_v33, %v1158_v29  ;;  %v838_v38 = vmul.f32 %v1027_v33, %v1162_v32 }
 0x7af   :  { %814 = vperm.xlu1 %999, %v805_v31   ;;  %v839_v39 = vmul.f32 %v1027_v33, %v1187_v15  ;;  %v86_v0 = vadd.f32 %v1105_v50, %v1119_v58 }
 0x7b6   :  { %848 = vperm.xlu0 %997, %v837_v45   ;;  %820 = vperm.xlu2 %1001, %v807_v34  }
 0x7be   :  { %895 = vperm.xlu0 %997, %v880_v35   ;;  %823 = vperm.xlu2 %1001, %v808_v36  }
 0x7c6   :  { %886 = vperm.xlu2 %1001, %v877_v12  }
 0x7ce   :  { %767 = vperm.xlu2 %1001, %v1027_v33  }
 0x7d6   :  { %845 = vperm.xlu2 %1001, %v836_v37  }
 0x7de   :  { %851 = vperm.xlu2 %1001, %v838_v38  }
 0x7e6   :  { %854 = vperm.xlu2 %1001, %v839_v39  }
 0x7ee   :  { %892 = vperm.xlu2 %1001, %v879_v40  }
 0x808   :  { %v818_v7 = vpop.permute.xlu2 %817 }
 0x809   :  { %v826_v8 = vperm.slane %v818_v7, %v1148_v18 }
 0x810   :  { %v821_v56 = vpop.permute.xlu2 %820 }
 0x811   :  { %v827_v53 = vperm.slane %v821_v56, %v1148_v18 }
 0x818   :  { %v824_v41 = vpop.permute.xlu2 %823 }
 0x819   :  { %v828_v54 = vperm.slane %v824_v41, %v1148_v18 }
 0x820   :  { %v887_v43 = vpop.permute.xlu2 %886  ;;  %v890_v42 = vpop.permute.xlu0 %889 }
 0x821   :  { %v815_v46 = vpop.permute.xlu1 %814  ;;  %v898_v19 = vperm.slane %v890_v42, %v1148_v18  ;;  %v897_v20 = vperm.slane %v887_v43, %v1148_v18 }
 0x822   :  { %v825_v47 = vperm.slane %v815_v46, %v1148_v18 }
 0x823   :  { %v901_v49 = vsel %vm156_vm1, %v898_v19, %v897_v20 }
 0x824   :  { %v829_v61 = vsel %vm156_vm1, %v826_v8, %v825_v47 }
 0x825   :  { %v830_v62 = vsel %vm158_vm2, %v827_v53, %v829_v61 }
 0x826   :  { %v831_v60 = vsel %vm160_vm3, %v828_v54, %v830_v62 }
 0x827   :  { %v833_v63 = vsel %vm45_vm0, %v831_v60, 0.0 }
 0x828   :  { %834 = vadd.xlane.f32.xlu1 %v833_v63  ;;  %v768_v3 = vpop.permute.xlu2 %767  ;;  %v849_v48 = vpop.permute.xlu0 %848 }
 0x829   :  { %v769_v4 = vperm.slane %v768_v3, %v1148_v18  ;;  %v857_v44 = vperm.slane %v849_v48, %v1148_v18 }
 0x82b   :  { %771 = vst.msk [vmem:[%s1480_s2 + $0x5] sm:$0x1] %vm189_vm4, %v769_v4 }
 0x830   :  { %v846_v5 = vpop.permute.xlu2 %845  ;;  %v896_v21 = vpop.permute.xlu0 %895 }
 0x831   :  { %v856_v6 = vperm.slane %v846_v5, %v1148_v18  ;;  %v900_v24 = vperm.slane %v896_v21, %v1148_v18 }
 0x833   :  { %v860_v11 = vsel %vm156_vm1, %v857_v44, %v856_v6 }
 0x838   :  { %v852_v57 = vpop.permute.xlu2 %851 }
 0x839   :  { %v858_v9 = vperm.slane %v852_v57, %v1148_v18 }
 0x83b   :  { %v861_v14 = vsel %vm158_vm2, %v858_v9, %v860_v11 }
 0x840   :  { %v855_v10 = vpop.permute.xlu2 %854 }
 0x841   :  { %v859_v13 = vperm.slane %v855_v10, %v1148_v18 }
 0x843   :  { %v862_v16 = vsel %vm160_vm3, %v859_v13, %v861_v14 }
 0x844   :  { %v864_v17 = vsel %vm45_vm0, %v862_v16, 0.0 }
 0x845   :  { %865 = vadd.xlane.f32.xlu1 %v864_v17 }
 0x848   :  { %v893_v22 = vpop.permute.xlu2 %892 }
 0x849   :  { %v899_v23 = vperm.slane %v893_v22, %v1148_v18 }
 0x84b   :  { %v902_v25 = vsel %vm158_vm2, %v899_v23, %v901_v49 }
 0x84c   :  { %v903_v26 = vsel %vm160_vm3, %v900_v24, %v902_v25 }
 0x84d   :  { %v905_v27 = vsel %vm45_vm0, %v903_v26, 0.0 }
 0x84e   :  { %906 = vadd.xlane.f32.xlu2 %v905_v27 }
 0x89b   :  { %v835_v55 = vpop.xlane.xlu1 %834 }
 0x8b8   :  { %v866_v33 = vpop.xlane.xlu1 %865 }
 0x8b9   :  { %v867_v45 = vadd.f32 %v866_v33, %v835_v55 }
 0x8bb   :  { %v868_v35 = vadd.f32 %v867_v45, %v1126_v1 }
 0x8c1   :  { %v907_v28 = vpop.xlane.xlu2 %906 }
 0x8c2   :  { %v908_v31 = vadd.f32 %v907_v28, %v86_v0 }
 0x8c4   :  { %1028 = vtanh.f32 %v908_v31 }
 0x8c5   :  { %1030 = vtanh.f32 %v868_v35 }
 0x8ca   :  { %v1029_v34 = vpop.eup %1028 }
 0x8cb   :  { %v911_v36 = vmul.f32 %v1029_v34, %v1107_v51  ;;  %v910_v12 = vmul.f32 %v1029_v34, %v1121_v59  ;;  %v912_v37 = vmul.f32 %v1029_v34, %v1128_v2  ;;  %v1031_v38 = vpop.eup %1030  ;;  %v913_v50 = vmul.f32 %v1029_v34, %v1109_v52 }
 0x8cc   :  { %v941_v58 = vmul.f32 %v1031_v38, %v1158_v29  ;;  %v942_v39 = vmul.f32 %v1031_v38, %v1160_v30  ;;  %v943_v51 = vmul.f32 %v1031_v38, %v1162_v32  ;;  %v944_v59 = vmul.f32 %v1031_v38, %v1187_v15 }
 0x8cd   :  { %922 = vperm.xlu0 %997, %v911_v36   ;;  %919 = vperm.xlu1 %999, %v910_v12  }
 0x8d5   :  { %925 = vperm.xlu1 %999, %v912_v37   ;;  %872 = vperm.xlu0 %997, %v1031_v38  }
 0x8dd   :  { %928 = vperm.xlu1 %999, %v913_v50   ;;  %950 = vperm.xlu0 %997, %v941_v58  }
 0x8e5   :  { %953 = vperm.xlu0 %997, %v942_v39  }
 0x8ed   :  { %956 = vperm.xlu0 %997, %v943_v51  }
 0x8f5   :  { %959 = vperm.xlu0 %997, %v944_v59  }
 0x93f   :  { %v923_v40 = vpop.permute.xlu0 %922  ;;  %v920_v2 = vpop.permute.xlu1 %919 }
 0x940   :  { %v931_v52 = vperm.slane %v923_v40, %v1148_v18  ;;  %v930_v29 = vperm.slane %v920_v2, %v1148_v18 }
 0x942   :  { %v934_v43 = vsel %vm156_vm1, %v931_v52, %v930_v29 }
 0x947   :  { %v873_v7 = vpop.permute.xlu0 %872  ;;  %v926_v56 = vpop.permute.xlu1 %925 }
 0x948   :  { %v874_v41 = vperm.slane %v873_v7, %v1148_v18  ;;  %v932_v30 = vperm.slane %v926_v56, %v1148_v18 }
 0x94a   :  { %876 = vst.msk [vmem:[%s1480_s2 + $0x6] sm:$0x1] %vm189_vm4, %v874_v41  ;;  %v935_v8 = vsel %vm158_vm2, %v932_v30, %v934_v43 }
 0x94f   :  { %v951_v32 = vpop.permute.xlu0 %950  ;;  %v929_v15 = vpop.permute.xlu1 %928 }
 0x950   :  { %v933_v46 = vperm.slane %v929_v15, %v1148_v18  ;;  %v961_v63 = vperm.slane %v951_v32, %v1148_v18 }
 0x952   :  { %v936_v47 = vsel %vm160_vm3, %v933_v46, %v935_v8 }
 0x953   :  { %v938_v53 = vsel %vm45_vm0, %v936_v47, 0.0 }
 0x954   :  { %939 = vadd.xlane.f32.xlu2 %v938_v53 }
 0x957   :  { %v954_v54 = vpop.permute.xlu0 %953 }
 0x958   :  { %v962_v62 = vperm.slane %v954_v54, %v1148_v18 }
 0x95a   :  { %v965_v4 = vsel %vm156_vm1, %v962_v62, %v961_v63 }
 0x95f   :  { %v957_v61 = vpop.permute.xlu0 %956 }
 0x960   :  { %v963_v60 = vperm.slane %v957_v61, %v1148_v18 }
 0x962   :  { %v966_v42 = vsel %vm158_vm2, %v963_v60, %v965_v4 }
 0x967   :  { %v960_v3 = vpop.permute.xlu0 %959 }
 0x968   :  { %v964_v5 = vperm.slane %v960_v3, %v1148_v18 }
 0x96a   :  { %v967_v57 = vsel %vm160_vm3, %v964_v5, %v966_v42 }
 0x96b   :  { %v969_v48 = vsel %vm45_vm0, %v967_v57, 0.0 }
 0x96c   :  { %970 = vadd.xlane.f32.xlu1 %v969_v48 }
 0x9c7   :  { %v940_v6 = vpop.xlane.xlu2 %939 }
 0x9df   :  { %v971_v9 = vpop.xlane.xlu1 %970 }
 0x9e0   :  { %v972_v44 = vadd.f32 %v971_v9, %v940_v6 }
 0x9e2   :  { %v973_v10 = vadd.f32 %v972_v44, %v1126_v1 }
 0x9e4   :  { %1032 = vtanh.f32 %v973_v10 }
 0x9ea   :  { %v1033_v11 = vpop.eup %1032 }
 0x9eb   :  { %977 = vperm.xlu0 %997, %v1033_v11  }
 0xa5d   :  { %v978_v13 = vpop.permute.xlu0 %977 }
 0xa5e   :  { %v979_v14 = vperm.slane %v978_v13, %v1148_v18 }
 0xa60   :  { %981 = vst.msk [vmem:[%s1480_s2 + $0x7] sm:$0x1] %vm189_vm4, %v979_v14 }

</bundles_post_ra>
